<compile_context>
chip_gen: v5e
topology: v5e:2x2
jax: 0.10.0
libtpu: 0.0.40
codegen_flags: <defaults>
</compile_context>

<pallas_src>
import jax
import jax.numpy as jnp
from jax import lax
from jax.experimental import pallas as pl
from jax.experimental.pallas import tpu as pltpu


def _round_up(x, m):
    return ((x + m - 1) // m) * m


def _cdiv(a, b):
    return (a + b - 1) // b


def _tensorcores_per_chip():
    """TensorCores per chip: v7x (and v4 megacore) have 2; v5e/v6e have 1."""
    try:
        kind = jax.devices()[0].device_kind.lower()
    except Exception:
        return 1
    if "v7" in kind or "v4" in kind:
        return 2
    return 1


def _fused_matmul_kernel(x_ref, w_ref, o_ref):
    # Single-K-block path: one vmatmul + lane-dense store.  Bias is folded
    # into the K axis (ones-column in LHS, bias row in W): no epilogue add.
    o_ref[...] = jnp.dot(
        x_ref[...], w_ref[...], preferred_element_type=jnp.float32
    ).astype(o_ref.dtype)


def _fused_matmul_ktiled_kernel(x_ref, w_ref, o_ref, acc_ref):
    # K-tiled path (production channel counts): innermost "arbitrary" K axis,
    # f32 accumulator resident in VMEM scratch.
    @pl.when(pl.program_id(1) == 0)
    def _():
        acc_ref[...] = jnp.zeros_like(acc_ref)

    acc_ref[...] += jnp.dot(
        x_ref[...], w_ref[...], preferred_element_type=jnp.float32)

    @pl.when(pl.program_id(1) == pl.num_programs(1) - 1)
    def _():
        o_ref[...] = acc_ref[...].astype(o_ref.dtype)


def classifier_module_forward(x_nchw, weights, biases, dilations, paddings,
                              *, max_tile_m=1024, max_tile_k=4096):
    """Pallas forward of Classifier_Module.

    x_nchw:   (N, Cin, H, W) float32
    weights:  list of (Cout, Cin, 3, 3) float32  (PyTorch OIHW layout)
    biases:   list of (Cout,) float32
    Returns:  (N, Cout, H, W) float32
    """
    N, Cin, H, W = x_nchw.shape
    Cout = weights[0].shape[0]

    # Only the first two convs participate in forward (module bug reproduced).
    n_used = 2
    dil_pad_used = list(zip(dilations[:n_used], paddings[:n_used]))

    # Shared spatial zero-padding amount covering both used convs.
    P = max(max(p, 2 * d - p) for d, p in dil_pad_used)

    # NCHW -> NHWC (channels last) and pad spatially once.
    x_nhwc = jnp.transpose(x_nchw, (0, 2, 3, 1)).astype(jnp.float32)
    x_pad = jnp.pad(x_nhwc, ((0, 0), (P, P), (P, P), (0, 0)))

    # im2col: for each used conv x 9 taps, take the shifted HxW window and
    # concatenate along channels -> (N, H, W, 18*Cin).  Static slices, fused
    # by XLA; the kernel sees an already lane-dense LHS.
    taps = []
    for d, p in dil_pad_used:
        for kh in range(3):
            for kw in range(3):
                h0 = P - p + kh * d
                w0 = P - p + kw * d
                taps.append(x_pad[:, h0:h0 + H, w0:w0 + W, :])
    K = n_used * 9 * Cin
    M = N * H * W
    lhs = jnp.concatenate(taps, axis=-1).reshape(M, K)

    # Weights: OIHW -> per-conv (3,3,Cin,Cout) -> (9*Cin, Cout), stacked along
    # K in the SAME tap order as the LHS concat above.
    w_taps = []
    for c in range(n_used):
        w_c = jnp.transpose(weights[c], (2, 3, 1, 0))       # (3, 3, Cin, Cout)
        w_taps.append(w_c.reshape(9 * Cin, Cout))
    w_fused = jnp.concatenate(w_taps, axis=0).astype(jnp.float32)   # (K, Cout)

    # Fold the bias into the matmul: ones-column at LHS[:, K], bias row at
    # W[K, :].  (b0 + b1 is exactly the reference semantics.)
    b_fused = (biases[0] + biases[1]).astype(jnp.float32)           # (Cout,)
    lhs = jnp.concatenate([lhs, jnp.ones((M, 1), jnp.float32)], axis=-1)
    w_fused = jnp.concatenate([w_fused, b_fused[None, :]], axis=0)
    Kb = K + 1

    # --- Tiling -----------------------------------------------------------
    Np = max(128, _round_up(Cout, 128))          # lane-dense unmasked stores
    Kp = max(128, _round_up(Kb, 128))
    tk = min(Kp, max(128, _round_up(max_tile_k, 128)))
    Kp = _round_up(Kp, tk)
    k_steps = Kp // tk

    n_tc = _tensorcores_per_chip()
    Mp16 = _round_up(M, 16)                      # bf16 sublane packing
    tile_m = min(_round_up(_cdiv(Mp16, n_tc), 16), _round_up(max_tile_m, 16))
    Mp = _round_up(Mp16, tile_m)
    m_steps = Mp // tile_m

    # bf16 inputs, f32 accumulation (native MXU path; halves HBM/VMEM bytes).
    lhs_pad = jnp.pad(lhs, ((0, Mp - M), (0, Kp - Kb))).astype(jnp.bfloat16)
    w_pad = jnp.pad(w_fused,
                    ((0, Kp - Kb), (0, Np - Cout))).astype(jnp.bfloat16)

    # Explicit VMEM limit only when the tile working set outgrows the default
    # scoped limit (production K); clamped below v7x's 64 MiB physical VMEM.
    vmem_est = (2 * tile_m * tk * 2       # double-buffered bf16 LHS tiles
                + 2 * tk * Np * 2         # double-buffered bf16 weight tiles
                + 2 * tile_m * Np * 4     # double-buffered f32 output tiles
                + tile_m * Np * 4)        # f32 accumulator scratch
    cp_kwargs = {}
    if vmem_est > (16 << 20):
        cp_kwargs["vmem_limit_bytes"] = int(min(2 * vmem_est, 60 << 20))

    if k_steps == 1:
        out_pad = pl.pallas_call(
            _fused_matmul_kernel,
            out_shape=jax.ShapeDtypeStruct((Mp, Np), jnp.float32),
            grid=(m_steps,),
            in_specs=[
                pl.BlockSpec((tile_m, Kp), lambda i: (i, 0)),
                pl.BlockSpec((Kp, Np), lambda i: (0, 0)),
            ],
            out_specs=pl.BlockSpec((tile_m, Np), lambda i: (i, 0)),
            compiler_params=pltpu.CompilerParams(
                dimension_semantics=("parallel",), **cp_kwargs),
        )(lhs_pad, w_pad)
    else:
        out_pad = pl.pallas_call(
            _fused_matmul_ktiled_kernel,
            out_shape=jax.ShapeDtypeStruct((Mp, Np), jnp.float32),
            grid=(m_steps, k_steps),
            in_specs=[
                pl.BlockSpec((tile_m, tk), lambda i, k: (i, k)),
                pl.BlockSpec((tk, Np), lambda i, k: (k, 0)),
            ],
            out_specs=pl.BlockSpec((tile_m, Np), lambda i, k: (i, 0)),
            scratch_shapes=[pltpu.VMEM((tile_m, Np), jnp.float32)],
            compiler_params=pltpu.CompilerParams(
                dimension_semantics=("parallel", "arbitrary"), **cp_kwargs),
        )(lhs_pad, w_pad)

    # Slice back to the real M / Cout, then NHWC -> NCHW.
    out_nhwc = out_pad[:M, :Cout].reshape(N, H, W, Cout)
    return jnp.transpose(out_nhwc, (0, 3, 1, 2))


def _reference_forward(x_nchw, weights, biases, dilations, paddings):
    """Pure-JAX (f32) reference matching the PyTorch forward exactly."""
    def conv(c):
        d, p = dilations[c], paddings[c]
        y = lax.conv_general_dilated(
            x_nchw, weights[c],
            window_strides=(1, 1),
            padding=[(p, p), (p, p)],
            rhs_dilation=(d, d),
            dimension_numbers=("NCHW", "OIHW", "NCHW"))
        return y + biases[c][None, :, None, None]

    out = conv(0)
    out = out + conv(1)  # loop body runs once, then returns
    return out


if __name__ == "__main__":
    # Small deterministic example consistent with the module.
    N, Cin, H, W = 2, 4, 16, 16
    num_classes = 6
    dilation_series = [6, 12, 18, 24]
    padding_series = [6, 12, 18, 24]

    key = jax.random.PRNGKey(0)
    kx, *kparams = jax.random.split(key, 1 + 2 * len(dilation_series))

    x = jax.random.normal(kx, (N, Cin, H, W), dtype=jnp.float32)

    weights, biases = [], []
    for i in range(len(dilation_series)):
        kw_, kb_ = kparams[2 * i], kparams[2 * i + 1]
        # m.weight.data.normal_(0, 0.01)
        weights.append(0.01 * jax.random.normal(
            kw_, (num_classes, Cin, 3, 3), dtype=jnp.float32))
        # nn.Conv2d default bias init: U(-1/sqrt(fan_in), 1/sqrt(fan_in))
        bound = 1.0 / jnp.sqrt(jnp.float32(Cin * 3 * 3))
        biases.append(jax.random.uniform(
            kb_, (num_classes,), minval=-bound, maxval=bound,
            dtype=jnp.float32))

    out = classifier_module_forward(
        x, weights, biases, dilation_series, padding_series)
    out = jax.block_until_ready(out)

    ref = _reference_forward(x, weights, biases, dilation_series,
                             padding_series)
    assert out.shape == (N, num_classes, H, W)
    # Tolerance loosened vs. the pure-f32 version because LHS/weights are fed
    # to the MXU in bf16 (f32 accumulation); errors here are O(1e-3).
    assert jnp.allclose(out, ref, atol=2e-2, rtol=2e-2)

    print("KERNEL_OK")
</pallas_src>

<mosaic_0001>
module attributes {stable_mosaic.version = 11 : i64} {
  func.func @_fused_matmul_kernel(%arg0: i32, %arg1: memref<512x128xbf16, #tpu.memory_space<vmem>>, %arg2: memref<128x128xbf16, #tpu.memory_space<vmem>>, %arg3: memref<512x128xf32, #tpu.memory_space<vmem>>) attributes {dimension_semantics = [#tpu.dimension_semantics<parallel>], iteration_bounds = array<i64: 1>, scalar_prefetch = 0 : i64, scratch_operands = 0 : i64, tpu.core_type = #tpu.core_type<tc>, window_params = [{transform_indices = @transform_0, window_bounds = array<i64: 512, 128>}, {pipeline_mode = #tpu.pipeline_mode<synchronous>, transform_indices = @transform_1, window_bounds = array<i64: 128, 128>}, {transform_indices = @transform_2, window_bounds = array<i64: 512, 128>}]} {
    %c0 = arith.constant 0 : index
    %c0_0 = arith.constant 0 : index
    %0 = vector.load %arg1[%c0, %c0_0] : memref<512x128xbf16, #tpu.memory_space<vmem>>, vector<512x128xbf16>
    %c0_1 = arith.constant 0 : index
    %c0_2 = arith.constant 0 : index
    %1 = vector.load %arg2[%c0_1, %c0_2] : memref<128x128xbf16, #tpu.memory_space<vmem>>, vector<128x128xbf16>
    %cst = arith.constant dense<0.000000e+00> : vector<512x128xf32>
    %2 = tpu.matmul %0, %1, %cst {dimension_numbers = #tpu.dot_dimension_numbers<[1], [0], [0], [1], [0, 0, 1, 1], [], []>} : vector<512x128xbf16>, vector<128x128xbf16>, vector<512x128xf32> -> vector<512x128xf32>
    %c0_3 = arith.constant 0 : index
    %c0_4 = arith.constant 0 : index
    %3 = vector.load %arg3[%c0_3, %c0_4] : memref<512x128xf32, #tpu.memory_space<vmem>>, vector<512x128xf32>
    tpu.vector_store %arg3[%c0_3, %c0_4], %2 {strides = array<i32>} : memref<512x128xf32, #tpu.memory_space<vmem>>, vector<512x128xf32>,
    return
  }
  func.func @transform_0(%arg0: i32) -> (i32, i32) {
    %c0_i32 = arith.constant 0 : i32
    %c0_i32_0 = arith.constant 0 : i32
    return %arg0, %c0_i32 : i32, i32
  }
  func.func @transform_1(%arg0: i32) -> (i32, i32) {
    %c0_i32 = arith.constant 0 : i32
    %c0_i32_0 = arith.constant 0 : i32
    %c0_i32_1 = arith.constant 0 : i32
    return %c0_i32, %c0_i32_0 : i32, i32
  }
  func.func @transform_2(%arg0: i32) -> (i32, i32) {
    %c0_i32 = arith.constant 0 : i32
    %c0_i32_0 = arith.constant 0 : i32
    return %arg0, %c0_i32 : i32, i32
  }
}

</mosaic_0001>

<bundles_post_ra>
// kernel: tpu_custom_call.1
= control target key start
LH: loop header
LB: loop body
LE: loop exit
PB: predicated region body
PF: predicated region fallthrough
CT: control target
= control target key end

     0   :  { %7 = vsyncpa [#allocation3], 0  ;;  %s957_s0 = inlined_call_operand.hbm [shape: bf16[512,128], index: 0, kind: input, shape index: {}]   ;;  %s958_s1 = inlined_call_operand.hbm [shape: bf16[128,128], index: 1, kind: input, shape index: {}]   ;;  %s959_s2 = inlined_call_operand.hbm [shape: f32[512,128], index: 2, kind: output, shape index: {}]  }
   0x1   :  { %8 = vsyncpa [#allocation6], 0 }
   0x2   :  { %9 = vsyncpa [#allocation4], 0  ;;  %s14_s11 = sshll.u32 %s957_s0, 4  ;;  %s926_s12 = smov [#allocation2]   ;;  %s15_s11 = int_to_ptr.hbm [resolvable:$true] %s14_s11 }
   0x3   :  { %s16_s13 = sshll.u32 %s926_s12, 4  ;;  %s27_s16 = sshll.u32 %s958_s1, 4  ;;  %s17_s13 = int_to_ptr.vmem [resolvable:$true] %s16_s13  ;;  %s28_s16 = int_to_ptr.hbm [resolvable:$true] %s27_s16 }
   0x4   :  { %s927_s17 = smov 64   ;;  %s928_s18 = smov 4  }
   0x5   :  { %22 = dma.hbm_to_vmem [thread:$0]  %s15_s11, 4096, %s17_s13, [#allocation3], %s927_s17, %s927_s17, %s928_s18  }
   0x6   :  { %s929_s19 = smov [#allocation5]  }
   0x7   :  { %s29_s20 = sshll.u32 %s929_s19, 4  ;;  %s30_s20 = int_to_ptr.vmem [resolvable:$true] %s29_s20 }
   0x8   :  { %35 = dma.hbm_to_vmem [thread:$0]  %s28_s16, 1024, %s30_s20, [#allocation6], %s927_s17, %s927_s17, %s928_s18  }
   0x9   :  { %920 = dma.done.wait [#allocation3], 4096  }
   0xa   :  { %921 = vsyncadd [#allocation3], 4294963200 }
   0xb   :  { %922 = dma.done.wait [#allocation6], 1024  }
   0xc   :  { %923 = vsyncadd [#allocation6], 4294966272  ;;  %v816_v0 = vld [vmem:[#allocation5 + $0x38] sm:$0xff]  ;;  %v815_v1 = vld [vmem:[#allocation5 + $0x30] sm:$0xff]  ;;  %s930_s0 = smov [#allocation7]   ;;  %s603_s23 = sshll.u32 %s959_s2, 4  ;;  %s604_s23 = int_to_ptr.hbm [resolvable:$true] %s603_s23 }
   0xd   :  { %364 = vmatpush.bf16.msra.mxu0 %v816_v0  ;;  %817 = vmatpush.bf16.msra.mxu1 %v816_v0  ;;  %v814_v2 = vld [vmem:[#allocation5 + $0x28] sm:$0xff]  ;;  %v813_v3 = vld [vmem:[#allocation5 + $0x20] sm:$0xff]  ;;  %v812_v4 = vld [vmem:[#allocation5 + $0x18] sm:$0xff]  ;;  %s601_s1 = sshll.u32 %s930_s0, 4  ;;  %s931_s24 = smov 128   ;;  %s602_s1 = int_to_ptr.vmem [resolvable:$true] %s601_s1 }
   0xe   :  { %818 = vmatpush.bf16.msra.mxu2 %v816_v0  ;;  %819 = vmatpush.bf16.msra.mxu3 %v816_v0  ;;  %v811_v5 = vld [vmem:[#allocation5 + $0x10] sm:$0xff]  ;;  %v810_v6 = vld [vmem:[#allocation5 + $0x8] sm:$0xff]  ;;  %v809_v7 = vld [vmem:[#allocation5] sm:$0xff]  ;;  %s932_s25 = smov 8  }
   0xf   :  { %v777_v8 = vld [vmem:[#allocation2] sm:$0xff]  ;;  %v778_v12 = vld [vmem:[#allocation2 + $0x8] sm:$0xff]  ;;  %v779_v16 = vld [vmem:[#allocation2 + $0x10] sm:$0xff] }
  0x10   :  { %v785_v9 = vld [vmem:[#allocation2 + $0x40] sm:$0xff]  ;;  %v786_v13 = vld [vmem:[#allocation2 + $0x48] sm:$0xff]  ;;  %v787_v17 = vld [vmem:[#allocation2 + $0x50] sm:$0xff] }
  0x11   :  { %365 = vmatpush.bf16.msra.mxu0 %v815_v1  ;;  %820 = vmatpush.bf16.msra.mxu1 %v815_v1  ;;  %v793_v10 = vld [vmem:[#allocation2 + $0x80] sm:$0xff]  ;;  %v794_v14 = vld [vmem:[#allocation2 + $0x88] sm:$0xff]  ;;  %v795_v18 = vld [vmem:[#allocation2 + $0x90] sm:$0xff] }
  0x12   :  { %821 = vmatpush.bf16.msra.mxu2 %v815_v1  ;;  %822 = vmatpush.bf16.msra.mxu3 %v815_v1  ;;  %v801_v11 = vld [vmem:[#allocation2 + $0xc0] sm:$0xff]  ;;  %v802_v15 = vld [vmem:[#allocation2 + $0xc8] sm:$0xff]  ;;  %v803_v19 = vld [vmem:[#allocation2 + $0xd0] sm:$0xff] }
  0x13   :  { %v780_v20 = vld [vmem:[#allocation2 + $0x18] sm:$0xff]  ;;  %v781_v24 = vld [vmem:[#allocation2 + $0x20] sm:$0xff]  ;;  %v782_v28 = vld [vmem:[#allocation2 + $0x28] sm:$0xff] }
  0x14   :  { %v788_v21 = vld [vmem:[#allocation2 + $0x58] sm:$0xff]  ;;  %v789_v25 = vld [vmem:[#allocation2 + $0x60] sm:$0xff]  ;;  %v790_v29 = vld [vmem:[#allocation2 + $0x68] sm:$0xff] }
  0x15   :  { %366 = vmatpush.bf16.msra.mxu0 %v814_v2  ;;  %823 = vmatpush.bf16.msra.mxu1 %v814_v2  ;;  %v796_v22 = vld [vmem:[#allocation2 + $0x98] sm:$0xff]  ;;  %v797_v26 = vld [vmem:[#allocation2 + $0xa0] sm:$0xff]  ;;  %v798_v30 = vld [vmem:[#allocation2 + $0xa8] sm:$0xff] }
  0x16   :  { %824 = vmatpush.bf16.msra.mxu2 %v814_v2  ;;  %825 = vmatpush.bf16.msra.mxu3 %v814_v2  ;;  %v804_v23 = vld [vmem:[#allocation2 + $0xd8] sm:$0xff]  ;;  %v805_v27 = vld [vmem:[#allocation2 + $0xe0] sm:$0xff]  ;;  %v806_v31 = vld [vmem:[#allocation2 + $0xe8] sm:$0xff] }
  0x17   :  { %v783_v32 = vld [vmem:[#allocation2 + $0x30] sm:$0xff]  ;;  %v784_v36 = vld [vmem:[#allocation2 + $0x38] sm:$0xff] }
  0x18   :  { %v791_v33 = vld [vmem:[#allocation2 + $0x70] sm:$0xff]  ;;  %v792_v37 = vld [vmem:[#allocation2 + $0x78] sm:$0xff] }
  0x19   :  { %367 = vmatpush.bf16.msra.mxu0 %v813_v3  ;;  %826 = vmatpush.bf16.msra.mxu1 %v813_v3  ;;  %v799_v34 = vld [vmem:[#allocation2 + $0xb0] sm:$0xff]  ;;  %v800_v38 = vld [vmem:[#allocation2 + $0xb8] sm:$0xff] }
  0x1a   :  { %827 = vmatpush.bf16.msra.mxu2 %v813_v3  ;;  %828 = vmatpush.bf16.msra.mxu3 %v813_v3  ;;  %v807_v35 = vld [vmem:[#allocation2 + $0xf0] sm:$0xff]  ;;  %v808_v39 = vld [vmem:[#allocation2 + $0xf8] sm:$0xff] }
  0x1d   :  { %368 = vmatpush.bf16.msra.mxu0 %v812_v4  ;;  %829 = vmatpush.bf16.msra.mxu1 %v812_v4 }
  0x1e   :  { %830 = vmatpush.bf16.msra.mxu2 %v812_v4  ;;  %831 = vmatpush.bf16.msra.mxu3 %v812_v4 }
  0x21   :  { %369 = vmatpush.bf16.msra.mxu0 %v811_v5  ;;  %832 = vmatpush.bf16.msra.mxu1 %v811_v5 }
  0x22   :  { %833 = vmatpush.bf16.msra.mxu2 %v811_v5  ;;  %834 = vmatpush.bf16.msra.mxu3 %v811_v5 }
  0x25   :  { %370 = vmatpush.bf16.msra.mxu0 %v810_v6  ;;  %835 = vmatpush.bf16.msra.mxu1 %v810_v6 }
  0x26   :  { %836 = vmatpush.bf16.msra.mxu2 %v810_v6  ;;  %837 = vmatpush.bf16.msra.mxu3 %v810_v6 }
  0x29   :  { %371 = vmatpush.bf16.msra.mxu0 %v809_v7  ;;  %838 = vmatpush.bf16.msra.mxu1 %v809_v7 }
  0x2a   :  { %839 = vmatpush.bf16.msra.mxu2 %v809_v7  ;;  %840 = vmatpush.bf16.msra.mxu3 %v809_v7 }
  0x2c   :  { %372 = vmatmul.bf16.vlgmr.msra.gmra.mxu0 %v777_v8  ;;  %412 = vmatmul.bf16.vlgmr.msra.gmra.mxu1 %v785_v9 }
  0x2d   :  { %452 = vmatmul.bf16.vlgmr.msra.gmra.mxu2 %v793_v10  ;;  %492 = vmatmul.bf16.vlgmr.msra.gmra.mxu3 %v801_v11 }
  0x3c   :  { %377 = vmatmul.bf16.gmra.mxu0 %v778_v12  ;;  %417 = vmatmul.bf16.gmra.mxu1 %v786_v13 }
  0x3d   :  { %457 = vmatmul.bf16.gmra.mxu2 %v794_v14  ;;  %497 = vmatmul.bf16.gmra.mxu3 %v802_v15 }
  0x4c   :  { %382 = vmatmul.bf16.gmra.mxu0 %v779_v16  ;;  %422 = vmatmul.bf16.gmra.mxu1 %v787_v17 }
  0x4d   :  { %462 = vmatmul.bf16.gmra.mxu2 %v795_v18  ;;  %502 = vmatmul.bf16.gmra.mxu3 %v803_v19 }
  0x5c   :  { %387 = vmatmul.bf16.gmra.mxu0 %v780_v20  ;;  %427 = vmatmul.bf16.gmra.mxu1 %v788_v21 }
  0x5d   :  { %467 = vmatmul.bf16.gmra.mxu2 %v796_v22  ;;  %507 = vmatmul.bf16.gmra.mxu3 %v804_v23 }
  0x6c   :  { %392 = vmatmul.bf16.gmra.mxu0 %v781_v24  ;;  %432 = vmatmul.bf16.gmra.mxu1 %v789_v25 }
  0x6d   :  { %472 = vmatmul.bf16.gmra.mxu2 %v797_v26  ;;  %512 = vmatmul.bf16.gmra.mxu3 %v805_v27 }
  0x7c   :  { %397 = vmatmul.bf16.gmra.mxu0 %v782_v28  ;;  %437 = vmatmul.bf16.gmra.mxu1 %v790_v29 }
  0x7d   :  { %477 = vmatmul.bf16.gmra.mxu2 %v798_v30  ;;  %517 = vmatmul.bf16.gmra.mxu3 %v806_v31 }
  0x8c   :  { %402 = vmatmul.bf16.gmra.mxu0 %v783_v32  ;;  %442 = vmatmul.bf16.gmra.mxu1 %v791_v33 }
  0x8d   :  { %482 = vmatmul.bf16.gmra.mxu2 %v799_v34  ;;  %522 = vmatmul.bf16.gmra.mxu3 %v807_v35 }
  0x9c   :  { %407 = vmatmul.bf16.gmra.mxu0 %v784_v36  ;;  %447 = vmatmul.bf16.gmra.mxu1 %v792_v37 }
  0x9d   :  { %487 = vmatmul.bf16.gmra.mxu2 %v800_v38  ;;  %527 = vmatmul.bf16.gmra.mxu3 %v808_v39 }
  0xa9   :  { %v373_v40 = vpop.f32.mrf.mxu0  ;;  %v413_v41 = vpop.f32.mrf.mxu1 }
  0xaa   :  { %533 = vst [vmem:[#allocation7] sm:$0xff] %v373_v40 }
  0xab   :  { %549 = vst [vmem:[#allocation7 + $0x80] sm:$0xff] %v413_v41 }
  0xb0   :  { %v453_v42 = vpop.f32.mrf.mxu2  ;;  %v493_v43 = vpop.f32.mrf.mxu3 }
  0xb1   :  { %565 = vst [vmem:[#allocation7 + $0x100] sm:$0xff] %v453_v42  ;;  %v375_v44 = vpop.f32.mrf.mxu0  ;;  %v415_v45 = vpop.f32.mrf.mxu1 }
  0xb2   :  { %581 = vst [vmem:[#allocation7 + $0x180] sm:$0xff] %v493_v43 }
  0xb3   :  { %534 = vst [vmem:[#allocation7 + $0x8] sm:$0xff] %v375_v44 }
  0xb4   :  { %550 = vst [vmem:[#allocation7 + $0x88] sm:$0xff] %v415_v45 }
  0xb8   :  { %v455_v46 = vpop.f32.mrf.mxu2  ;;  %v495_v47 = vpop.f32.mrf.mxu3 }
  0xb9   :  { %566 = vst [vmem:[#allocation7 + $0x108] sm:$0xff] %v455_v46  ;;  %v378_v48 = vpop.f32.mrf.mxu0  ;;  %v418_v49 = vpop.f32.mrf.mxu1 }
  0xba   :  { %582 = vst [vmem:[#allocation7 + $0x188] sm:$0xff] %v495_v47 }
  0xbb   :  { %535 = vst [vmem:[#allocation7 + $0x10] sm:$0xff] %v378_v48 }
  0xbc   :  { %551 = vst [vmem:[#allocation7 + $0x90] sm:$0xff] %v418_v49 }
  0xc0   :  { %v458_v50 = vpop.f32.mrf.mxu2  ;;  %v498_v51 = vpop.f32.mrf.mxu3 }
  0xc1   :  { %567 = vst [vmem:[#allocation7 + $0x110] sm:$0xff] %v458_v50  ;;  %v380_v52 = vpop.f32.mrf.mxu0  ;;  %v420_v53 = vpop.f32.mrf.mxu1 }
  0xc2   :  { %583 = vst [vmem:[#allocation7 + $0x190] sm:$0xff] %v498_v51 }
  0xc3   :  { %536 = vst [vmem:[#allocation7 + $0x18] sm:$0xff] %v380_v52 }
  0xc4   :  { %552 = vst [vmem:[#allocation7 + $0x98] sm:$0xff] %v420_v53 }
  0xc8   :  { %v460_v54 = vpop.f32.mrf.mxu2  ;;  %v500_v55 = vpop.f32.mrf.mxu3 }
  0xc9   :  { %568 = vst [vmem:[#allocation7 + $0x118] sm:$0xff] %v460_v54  ;;  %v383_v56 = vpop.f32.mrf.mxu0  ;;  %v423_v57 = vpop.f32.mrf.mxu1 }
  0xca   :  { %584 = vst [vmem:[#allocation7 + $0x198] sm:$0xff] %v500_v55 }
  0xcb   :  { %537 = vst [vmem:[#allocation7 + $0x20] sm:$0xff] %v383_v56 }
  0xcc   :  { %553 = vst [vmem:[#allocation7 + $0xa0] sm:$0xff] %v423_v57 }
  0xd0   :  { %v463_v58 = vpop.f32.mrf.mxu2  ;;  %v503_v59 = vpop.f32.mrf.mxu3 }
  0xd1   :  { %569 = vst [vmem:[#allocation7 + $0x120] sm:$0xff] %v463_v58  ;;  %v385_v60 = vpop.f32.mrf.mxu0  ;;  %v425_v61 = vpop.f32.mrf.mxu1 }
  0xd2   :  { %585 = vst [vmem:[#allocation7 + $0x1a0] sm:$0xff] %v503_v59 }
  0xd3   :  { %538 = vst [vmem:[#allocation7 + $0x28] sm:$0xff] %v385_v60 }
  0xd4   :  { %554 = vst [vmem:[#allocation7 + $0xa8] sm:$0xff] %v425_v61 }
  0xd8   :  { %v465_v62 = vpop.f32.mrf.mxu2  ;;  %v505_v63 = vpop.f32.mrf.mxu3 }
  0xd9   :  { %570 = vst [vmem:[#allocation7 + $0x128] sm:$0xff] %v465_v62  ;;  %v388_v0 = vpop.f32.mrf.mxu0  ;;  %v428_v1 = vpop.f32.mrf.mxu1 }
  0xda   :  { %586 = vst [vmem:[#allocation7 + $0x1a8] sm:$0xff] %v505_v63 }
  0xdb   :  { %539 = vst [vmem:[#allocation7 + $0x30] sm:$0xff] %v388_v0 }
  0xdc   :  { %555 = vst [vmem:[#allocation7 + $0xb0] sm:$0xff] %v428_v1 }
  0xe0   :  { %v468_v2 = vpop.f32.mrf.mxu2  ;;  %v508_v3 = vpop.f32.mrf.mxu3 }
  0xe1   :  { %571 = vst [vmem:[#allocation7 + $0x130] sm:$0xff] %v468_v2  ;;  %v390_v4 = vpop.f32.mrf.mxu0  ;;  %v430_v5 = vpop.f32.mrf.mxu1 }
  0xe2   :  { %587 = vst [vmem:[#allocation7 + $0x1b0] sm:$0xff] %v508_v3 }
  0xe3   :  { %540 = vst [vmem:[#allocation7 + $0x38] sm:$0xff] %v390_v4 }
  0xe4   :  { %556 = vst [vmem:[#allocation7 + $0xb8] sm:$0xff] %v430_v5 }
  0xe8   :  { %v470_v6 = vpop.f32.mrf.mxu2  ;;  %v510_v7 = vpop.f32.mrf.mxu3 }
  0xe9   :  { %572 = vst [vmem:[#allocation7 + $0x138] sm:$0xff] %v470_v6  ;;  %v393_v8 = vpop.f32.mrf.mxu0  ;;  %v433_v9 = vpop.f32.mrf.mxu1 }
  0xea   :  { %588 = vst [vmem:[#allocation7 + $0x1b8] sm:$0xff] %v510_v7 }
  0xeb   :  { %541 = vst [vmem:[#allocation7 + $0x40] sm:$0xff] %v393_v8 }
  0xec   :  { %557 = vst [vmem:[#allocation7 + $0xc0] sm:$0xff] %v433_v9 }
  0xf0   :  { %v473_v10 = vpop.f32.mrf.mxu2  ;;  %v513_v11 = vpop.f32.mrf.mxu3 }
  0xf1   :  { %573 = vst [vmem:[#allocation7 + $0x140] sm:$0xff] %v473_v10  ;;  %v395_v12 = vpop.f32.mrf.mxu0  ;;  %v435_v13 = vpop.f32.mrf.mxu1 }
  0xf2   :  { %589 = vst [vmem:[#allocation7 + $0x1c0] sm:$0xff] %v513_v11 }
  0xf3   :  { %542 = vst [vmem:[#allocation7 + $0x48] sm:$0xff] %v395_v12 }
  0xf4   :  { %558 = vst [vmem:[#allocation7 + $0xc8] sm:$0xff] %v435_v13 }
  0xf8   :  { %v475_v14 = vpop.f32.mrf.mxu2  ;;  %v515_v15 = vpop.f32.mrf.mxu3 }
  0xf9   :  { %574 = vst [vmem:[#allocation7 + $0x148] sm:$0xff] %v475_v14  ;;  %v398_v16 = vpop.f32.mrf.mxu0  ;;  %v438_v17 = vpop.f32.mrf.mxu1 }
  0xfa   :  { %590 = vst [vmem:[#allocation7 + $0x1c8] sm:$0xff] %v515_v15 }
  0xfb   :  { %543 = vst [vmem:[#allocation7 + $0x50] sm:$0xff] %v398_v16 }
  0xfc   :  { %559 = vst [vmem:[#allocation7 + $0xd0] sm:$0xff] %v438_v17 }
 0x100   :  { %v478_v18 = vpop.f32.mrf.mxu2  ;;  %v518_v19 = vpop.f32.mrf.mxu3 }
 0x101   :  { %575 = vst [vmem:[#allocation7 + $0x150] sm:$0xff] %v478_v18  ;;  %v400_v20 = vpop.f32.mrf.mxu0  ;;  %v440_v21 = vpop.f32.mrf.mxu1 }
 0x102   :  { %591 = vst [vmem:[#allocation7 + $0x1d0] sm:$0xff] %v518_v19 }
 0x103   :  { %544 = vst [vmem:[#allocation7 + $0x58] sm:$0xff] %v400_v20 }
 0x104   :  { %560 = vst [vmem:[#allocation7 + $0xd8] sm:$0xff] %v440_v21 }
 0x108   :  { %v480_v22 = vpop.f32.mrf.mxu2  ;;  %v520_v23 = vpop.f32.mrf.mxu3 }
 0x109   :  { %576 = vst [vmem:[#allocation7 + $0x158] sm:$0xff] %v480_v22  ;;  %v403_v24 = vpop.f32.mrf.mxu0  ;;  %v443_v25 = vpop.f32.mrf.mxu1 }
 0x10a   :  { %592 = vst [vmem:[#allocation7 + $0x1d8] sm:$0xff] %v520_v23 }
 0x10b   :  { %545 = vst [vmem:[#allocation7 + $0x60] sm:$0xff] %v403_v24 }
 0x10c   :  { %561 = vst [vmem:[#allocation7 + $0xe0] sm:$0xff] %v443_v25 }
 0x110   :  { %v483_v26 = vpop.f32.mrf.mxu2  ;;  %v523_v27 = vpop.f32.mrf.mxu3 }
 0x111   :  { %577 = vst [vmem:[#allocation7 + $0x160] sm:$0xff] %v483_v26  ;;  %v405_v28 = vpop.f32.mrf.mxu0  ;;  %v445_v29 = vpop.f32.mrf.mxu1 }
 0x112   :  { %593 = vst [vmem:[#allocation7 + $0x1e0] sm:$0xff] %v523_v27 }
 0x113   :  { %546 = vst [vmem:[#allocation7 + $0x68] sm:$0xff] %v405_v28 }
 0x114   :  { %562 = vst [vmem:[#allocation7 + $0xe8] sm:$0xff] %v445_v29 }
 0x118   :  { %v485_v30 = vpop.f32.mrf.mxu2  ;;  %v525_v31 = vpop.f32.mrf.mxu3 }
 0x119   :  { %578 = vst [vmem:[#allocation7 + $0x168] sm:$0xff] %v485_v30  ;;  %v408_v32 = vpop.f32.mrf.mxu0  ;;  %v448_v33 = vpop.f32.mrf.mxu1 }
 0x11a   :  { %594 = vst [vmem:[#allocation7 + $0x1e8] sm:$0xff] %v525_v31 }
 0x11b   :  { %547 = vst [vmem:[#allocation7 + $0x70] sm:$0xff] %v408_v32 }
 0x11c   :  { %563 = vst [vmem:[#allocation7 + $0xf0] sm:$0xff] %v448_v33 }
 0x120   :  { %v488_v34 = vpop.f32.mrf.mxu2  ;;  %v528_v35 = vpop.f32.mrf.mxu3 }
 0x121   :  { %579 = vst [vmem:[#allocation7 + $0x170] sm:$0xff] %v488_v34  ;;  %v410_v36 = vpop.f32.mrf.mxu0  ;;  %v450_v37 = vpop.f32.mrf.mxu1 }
 0x122   :  { %595 = vst [vmem:[#allocation7 + $0x1f0] sm:$0xff] %v528_v35 }
 0x123   :  { %548 = vst [vmem:[#allocation7 + $0x78] sm:$0xff] %v410_v36 }
 0x124   :  { %564 = vst [vmem:[#allocation7 + $0xf8] sm:$0xff] %v450_v37 }
 0x128   :  { %v490_v38 = vpop.f32.mrf.mxu2  ;;  %v530_v39 = vpop.f32.mrf.mxu3 }
 0x129   :  { %580 = vst [vmem:[#allocation7 + $0x178] sm:$0xff] %v490_v38 }
 0x12a   :  { %596 = vst [vmem:[#allocation7 + $0x1f8] sm:$0xff] %v530_v39 }
 0x12b   :  { %609 = dma.vmem_to_hbm [thread:$0]  %s602_s1, 8192, %s604_s23, [#allocation4], %s931_s24, %s931_s24, %s932_s25  }
 0x12c   :  { %924 = dma.done.wait [#allocation4], 8192  }
 0x12d   :  { %925 = vsyncadd [#allocation4], 4294959104 }
 0x12e   :  { %614 = vsyncpa [#allocation3], 1 }
 0x12f   :  { %615 = vsyncpa [#allocation6], 1 }
 0x130   :  { %616 = vsyncpa [#allocation4], 1 }

</bundles_post_ra>
